<compile_context>
chip_gen: v7x
topology: tpu7x:2x2x1
jax: 0.10.0
libtpu: 0.0.40
codegen_flags: <defaults>
</compile_context>

<pallas_src>
import functools

import jax
import jax.numpy as jnp
from jax import lax
from jax.experimental import pallas as pl
from jax.experimental.pallas import tpu as pltpu

LEAKY_SLOPE = 0.2                    # DGCNN / TeethGNN SharedMLP LeakyReLU(0.2)


def _lrelu(y):
    return jnp.where(y > 0, y, LEAKY_SLOPE * y)


def _device_kind():
    try:
        return jax.devices()[0].device_kind.lower()
    except Exception:
        return ""


def _vmem_limit():
    kind = _device_kind()
    if "v7" in kind:
        return 48 * 1024 * 1024          # 64 MiB physical on v7x -> headroom
    if "v5" in kind or "v6" in kind:
        return 96 * 1024 * 1024          # 128 MiB physical on v5e/v6e
    return 48 * 1024 * 1024              # conservative default


def _tile_target():
    # v7x has only 64 MiB VMEM -> keep N tiles at 512; v5e/v6e go bigger.
    return 512 if "v7" in _device_kind() else 1024


def _pick_tile(n, target):
    """Largest multiple of 8 that divides n and is <= target (else n)."""
    t = min(target, n)
    t -= t % 8
    while t > 0:
        if n % t == 0:
            return t
        t -= 8
    return n


def _pick_chunk(k, target=8):
    """Largest divisor of k that is <= target (K-chunk for the EdgeConv grid)."""
    t = min(k, target)
    while k % t:
        t -= 1
    return t


# ---------------------------------------------------------------------------
# Kernel 1: SharedMLP1d (1x1 conv + folded BN + LeakyReLU), tiled over (B, N)
# ---------------------------------------------------------------------------
def smlp_kernel(x_ref, w_ref, b_ref, o_ref):
    y = jnp.dot(x_ref[0], w_ref[...], preferred_element_type=jnp.float32)
    o_ref[0] = _lrelu(y + b_ref[...]).astype(o_ref.dtype)


def shared_mlp1d(x, w, b, *, tn, out_dtype):
    B, N, Cin = x.shape
    Cout = w.shape[1]
    return pl.pallas_call(
        smlp_kernel,
        out_shape=jax.ShapeDtypeStruct((B, N, Cout), out_dtype),
        grid=(B, N // tn),
        in_specs=[
            pl.BlockSpec((1, tn, Cin), lambda b, n: (b, n, 0)),
            pl.BlockSpec((Cin, Cout), lambda b, n: (0, 0)),
            pl.BlockSpec((1, Cout), lambda b, n: (0, 0)),
        ],
        out_specs=pl.BlockSpec((1, tn, Cout), lambda b, n: (b, n, 0)),
        compiler_params=pltpu.CompilerParams(
            dimension_semantics=("parallel", "parallel"),
            vmem_limit_bytes=_vmem_limit()),
    )(x, w, b)


# ---------------------------------------------------------------------------
# Kernel 2: knn - fused pairwise score + running top-k (indices only)
#   Augmented coords: q' = [2p, 1, 0..], k' = [p, -||p||^2, 0..] so
#   score_j = q'.k' = 2<q,k_j> - ||k_j||^2 comes straight out of one dot.
#   (-||q||^2 is constant per query row, so it never changes top-k membership.)
# ---------------------------------------------------------------------------
def knn_topk_kernel(q_ref, kp_ref, idx_ref, best_s, best_i, *, k, tk):
    ki = pl.program_id(2)

    scores = lax.dot_general(q_ref[0], kp_ref[0], (((1,), (1,)), ((), ())),
                             preferred_element_type=jnp.float32)      # (TQ, TK)
    base = jnp.float32(ki * tk)
    idx_f = base + lax.broadcasted_iota(
        jnp.int32, scores.shape, 1).astype(jnp.float32)

    # Tile-local top-k on the lane-aligned (TQ, TK) tile: 2 cross-lane
    # reductions per selection (max, then min-index over ties). Ties resolve
    # to the smallest global index, matching lax.top_k. Indices are carried as
    # exact f32 (N < 2^24 asserted in the wrapper).
    loc_s, loc_i = [], []
    s = scores
    for _ in range(k):
        m = jnp.max(s, axis=-1, keepdims=True)                        # (TQ, 1)
        sel = jnp.min(jnp.where(s == m, idx_f, jnp.inf),
                      axis=-1, keepdims=True)                         # (TQ, 1)
        loc_s.append(m)
        loc_i.append(sel)
        s = jnp.where(idx_f == sel, -jnp.inf, s)
    loc_s = jnp.concatenate(loc_s, axis=-1)                           # (TQ, k)
    loc_i = jnp.concatenate(loc_i, axis=-1)

    @pl.when(ki == 0)
    def _():
        best_s[...] = loc_s
        best_i[...] = loc_i

    @pl.when(ki > 0)
    def _():
        # Merge running best with the tile-local winners over a tiny (TQ, 2k)
        # pool; the misaligned work runs on 2k lanes only.
        pool_s = jnp.concatenate([best_s[...], loc_s], axis=-1)
        pool_i = jnp.concatenate([best_i[...], loc_i], axis=-1)
        sel_s, sel_i = [], []
        for _ in range(k):
            m = jnp.max(pool_s, axis=-1, keepdims=True)
            sel = jnp.min(jnp.where(pool_s == m, pool_i, jnp.inf),
                          axis=-1, keepdims=True)
            sel_s.append(m)
            sel_i.append(sel)
            pool_s = jnp.where(pool_i == sel, -jnp.inf, pool_s)
        best_s[...] = jnp.concatenate(sel_s, axis=-1)
        best_i[...] = jnp.concatenate(sel_i, axis=-1)

    @pl.when(ki == pl.num_programs(2) - 1)
    def _():
        idx_ref[0] = best_i[...].astype(jnp.int32)


def knn_indices(p, k, *, tq, tk):
    B, N, D = p.shape
    assert k <= tk and k <= N, "need at least k candidates per key tile"
    assert N < (1 << 24), "indices are carried exactly in f32"
    DP = 8   # pad coords to 8 lanes (zero lanes do not change scores)
    pf = p.astype(jnp.float32)
    sq = jnp.sum(pf * pf, axis=-1, keepdims=True)                     # (B,N,1)
    zpad = jnp.zeros((B, N, DP - D - 1), jnp.float32)
    q_aug = jnp.concatenate(
        [2.0 * pf, jnp.ones((B, N, 1), jnp.float32), zpad], axis=-1)  # (B,N,8)
    k_aug = jnp.concatenate([pf, -sq, zpad], axis=-1)                 # (B,N,8)

    kernel = functools.partial(knn_topk_kernel, k=k, tk=tk)
    return pl.pallas_call(
        kernel,
        out_shape=jax.ShapeDtypeStruct((B, N, k), jnp.int32),
        grid=(B, N // tq, N // tk),
        in_specs=[
            pl.BlockSpec((1, tq, DP), lambda b, qi, ki: (b, qi, 0)),
            pl.BlockSpec((1, tk, DP), lambda b, qi, ki: (b, ki, 0)),
        ],
        out_specs=pl.BlockSpec((1, tq, k), lambda b, qi, ki: (b, qi, 0)),
        scratch_shapes=[pltpu.VMEM((tq, k), jnp.float32),
                        pltpu.VMEM((tq, k), jnp.float32)],
        compiler_params=pltpu.CompilerParams(
            dimension_semantics=("parallel", "parallel", "arbitrary"),
            vmem_limit_bytes=_vmem_limit()),
    )(q_aug, k_aug)


# ---------------------------------------------------------------------------
# Kernel 3: fused EdgeConv (split weights, no edge tensor, K-chunked grid) +
#           smlp2 head.
#   [nbr - xi, xi] @ [W_top; W_bot] = nbr @ W_top + xi @ (W_bot - W_top)
#   The xi-dependent term z is computed once per N-tile (K-chunk 0) into VMEM
#   scratch; the K-max accumulates across the innermost "arbitrary" grid axis.
# ---------------------------------------------------------------------------
def edgeconv_head_kernel(x1_ref, nbr_ref, wt_ref, wd_ref, bc_ref,
                         w2a_ref, b2a_ref, w2b_ref, b2b_ref, w3_ref, b3_ref,
                         o_ref, z_ref, acc_ref):
    kci = pl.program_id(2)
    wt = wt_ref[...]

    @pl.when(kci == 0)
    def _():
        z_ref[...] = (jnp.dot(x1_ref[0], wd_ref[...],
                              preferred_element_type=jnp.float32) + bc_ref[...])
        acc_ref[...] = jnp.full_like(acc_ref, -jnp.inf)

    z = z_ref[...]

    def body(j, acc):
        y = _lrelu(jnp.dot(nbr_ref[j], wt,
                           preferred_element_type=jnp.float32) + z)
        return jnp.maximum(acc, y)

    # Chunk size <= 8, so the full unroll stays register-friendly.
    acc_ref[...] = lax.fori_loop(0, nbr_ref.shape[0], body, acc_ref[...],
                                 unroll=True)

    @pl.when(kci == pl.num_programs(2) - 1)
    def _():
        cd = wt.dtype
        h = _lrelu(jnp.dot(acc_ref[...].astype(cd), w2a_ref[...],
                           preferred_element_type=jnp.float32) + b2a_ref[...])
        # Dropout2d: identity at inference.
        h = _lrelu(jnp.dot(h.astype(cd), w2b_ref[...],
                           preferred_element_type=jnp.float32) + b2b_ref[...])
        o_ref[0] = (jnp.dot(h.astype(cd), w3_ref[...],
                            preferred_element_type=jnp.float32)
                    + b3_ref[...]).astype(o_ref.dtype)


def edgeconv_head(x1, nbr, wt, wd, bc, w2a, b2a, w2b, b2b, w3p, b3p, *,
                  tn, kc, out_dtype):
    B, N, C = x1.shape
    K = nbr.shape[1]
    Ce = wt.shape[1]
    C1 = w2a.shape[1]
    C2 = w2b.shape[1]
    Cp = w3p.shape[1]                                          # 128-padded
    return pl.pallas_call(
        edgeconv_head_kernel,
        out_shape=jax.ShapeDtypeStruct((B, N, Cp), out_dtype),
        grid=(B, N // tn, K // kc),
        in_specs=[
            pl.BlockSpec((1, tn, C), lambda b, n, kci: (b, n, 0)),           # x1
            pl.BlockSpec((None, kc, tn, C), lambda b, n, kci: (b, kci, n, 0)),  # nbr chunk
            pl.BlockSpec((C, Ce), lambda b, n, kci: (0, 0)),                 # W_top
            pl.BlockSpec((C, Ce), lambda b, n, kci: (0, 0)),                 # W_bot-W_top
            pl.BlockSpec((1, Ce), lambda b, n, kci: (0, 0)),                 # bc
            pl.BlockSpec((Ce, C1), lambda b, n, kci: (0, 0)),                # w2a
            pl.BlockSpec((1, C1), lambda b, n, kci: (0, 0)),
            pl.BlockSpec((C1, C2), lambda b, n, kci: (0, 0)),                # w2b
            pl.BlockSpec((1, C2), lambda b, n, kci: (0, 0)),
            pl.BlockSpec((C2, Cp), lambda b, n, kci: (0, 0)),                # w3 (padded)
            pl.BlockSpec((1, Cp), lambda b, n, kci: (0, 0)),
        ],
        out_specs=pl.BlockSpec((1, tn, Cp), lambda b, n, kci: (b, n, 0)),
        scratch_shapes=[pltpu.VMEM((tn, Ce), jnp.float32),    # z (xi-term)
                        pltpu.VMEM((tn, Ce), jnp.float32)],   # running K-max
        compiler_params=pltpu.CompilerParams(
            dimension_semantics=("parallel", "parallel", "arbitrary"),
            vmem_limit_bytes=_vmem_limit()),
    )(x1, nbr, wt, wd, bc, w2a, b2a, w2b, b2b, w3p, b3p)


# ---------------------------------------------------------------------------
# Forward pass
# ---------------------------------------------------------------------------
def semantic_branch(x, p, params, k, *, compute_dtype=jnp.bfloat16,
                    tile_n=None, tile_q=None, tile_k=None):
    B, N, _ = x.shape
    target = _tile_target()
    tn = tile_n or _pick_tile(N, target)
    tq = tile_q or _pick_tile(N, 256)        # smaller query tile: less live data
    tkk = tile_k or _pick_tile(N, target)
    cd = compute_dtype

    # 1) smlp1: SharedMLP1d([Cin, 256]); x pre-cast so its HBM stream is in the
    #    compute dtype (in the full model this convert fuses upstream).
    x1 = shared_mlp1d(x.astype(cd), params["w1"].astype(cd), params["b1"],
                      tn=tn, out_dtype=cd)                     # (B, N, 256)

    # 2) knn(p, k): fused augmented-coordinate score + running top-k (f32).
    idx = knn_indices(p, k, tq=tq, tk=tkk)                     # (B, N, k) int32

    # 3) Neighbor-feature gather in plain JAX, laid out (B, K, N, C) so the
    #    EdgeConv kernel indexes neighbors with a cheap leading-axis index.
    # TODO(synk): fuse this gather into the EdgeConv kernel (HBM-resident x1 +
    # in-kernel row gather) once a lowering-safe dynamic row gather exists;
    # per-row manual DMA (512 B rows) is descriptor-bound at small K.
    nbr = jax.vmap(lambda xb, ib: xb[ib])(x1, jnp.swapaxes(idx, 1, 2))

    # 4) Fused EdgeConv (split weights, K-chunked grid) + smlp2 head with a
    #    lane-dense 128-padded output in the compute dtype, sliced back here.
    C = x1.shape[-1]
    wc = params["wc"]
    w_top = wc[:C].astype(cd)
    w_delta = (wc[C:] - wc[:C]).astype(cd)
    out_ch = params["w3"].shape[1]
    cpad = (-out_ch) % 128
    w3p = jnp.pad(params["w3"], ((0, 0), (0, cpad))).astype(cd)
    b3p = jnp.pad(params["b3"], ((0, 0), (0, cpad)))
    kc = _pick_chunk(k)
    out = edgeconv_head(x1, nbr, w_top, w_delta, params["bc"],
                        params["w2a"].astype(cd), params["b2a"],
                        params["w2b"].astype(cd), params["b2b"],
                        w3p, b3p, tn=tn, kc=kc, out_dtype=cd)  # (B, N, Cpad)
    return out[..., :out_ch]


# ---------------------------------------------------------------------------
# Params / reference
# ---------------------------------------------------------------------------
def init_params(key, c_in, c_out):
    ks = jax.random.split(key, 6)

    def w(k, fan_in, fan_out):
        return jax.random.normal(k, (fan_in, fan_out), jnp.float32) / jnp.sqrt(
            jnp.float32(fan_in))

    return dict(
        # smlp1: SharedMLP1d([c_in, 256])
        w1=w(ks[0], c_in, 256), b1=jnp.zeros((1, 256), jnp.float32),
        # EdgeConv: SharedMLP2d([512, 256]) on edge features
        wc=w(ks[1], 512, 256), bc=jnp.zeros((1, 256), jnp.float32),
        # smlp2: [256->256], [256->128], Conv1d(128, c_out)
        w2a=w(ks[2], 256, 256), b2a=jnp.zeros((1, 256), jnp.float32),
        w2b=w(ks[3], 256, 128), b2b=jnp.zeros((1, 128), jnp.float32),
        w3=w(ks[4], 128, c_out),
        b3=0.01 * jax.random.normal(ks[5], (1, c_out), jnp.float32),
    )


def reference(x, p, params, k):
    """Pure-JAX f32 reference (same channels-last layout)."""
    hp = jax.lax.Precision.HIGHEST
    x1 = _lrelu(jnp.matmul(x, params["w1"], precision=hp) + params["b1"])
    inner = jnp.einsum("bnd,bmd->bnm", p, p, precision=hp)
    ssq = jnp.sum(p * p, axis=-1)
    neg_d = 2.0 * inner - ssq[:, :, None] - ssq[:, None, :]
    idx = jax.lax.top_k(neg_d, k)[1]
    nbr = jax.vmap(lambda xb, ib: xb[ib])(x1, idx)
    xi = jnp.broadcast_to(x1[:, :, None, :], nbr.shape)
    e = jnp.concatenate([nbr - xi, xi], axis=-1)               # (B, N, k, 512)
    y = _lrelu(jnp.einsum("bnkc,cd->bnkd", e, params["wc"], precision=hp)
               + params["bc"])
    x2 = jnp.max(y, axis=2)                                    # (B, N, 256)
    h = _lrelu(jnp.matmul(x2, params["w2a"], precision=hp) + params["b2a"])
    h = _lrelu(jnp.matmul(h, params["w2b"], precision=hp) + params["b2b"])
    return jnp.matmul(h, params["w3"], precision=hp) + params["b3"]


if __name__ == "__main__":
    # Small synthetic config: args.k=4, emb_dims=64, n_edgeconvs_backbone=1,
    # output_channels=8  ->  Cin = 64 + 1*64 = 128.
    B, N, K = 2, 16, 4
    emb_dims, n_edgeconvs, out_ch = 64, 1, 8
    Cin = emb_dims + n_edgeconvs * 64

    key = jax.random.PRNGKey(0)
    kx, kp, kw = jax.random.split(key, 3)
    x = jax.random.normal(kx, (B, N, Cin), jnp.float32)   # features (B, N, C)
    p = jax.random.normal(kp, (B, N, 3), jnp.float32)     # coords   (B, N, 3)
    params = init_params(kw, Cin, out_ch)

    ref = jax.block_until_ready(reference(x, p, params, K))

    # f32 compute path: tight check against the f32 reference.
    out_f32 = jax.block_until_ready(
        semantic_branch(x, p, params, K, compute_dtype=jnp.float32))
    assert out_f32.shape == (B, N, out_ch), out_f32.shape
    assert jnp.allclose(out_f32, ref, rtol=2e-2, atol=2e-2), (
        float(jnp.max(jnp.abs(out_f32 - ref))))

    # Default bf16 MXU path: loose check (bf16-vs-f32 envelope over 5 layers
    # plus the bf16 final store).
    out_bf16 = jax.block_until_ready(semantic_branch(x, p, params, K))
    assert out_bf16.shape == (B, N, out_ch), out_bf16.shape
    assert jnp.allclose(out_bf16.astype(jnp.float32), ref,
                        rtol=1.2e-1, atol=1.2e-1), (
        float(jnp.max(jnp.abs(out_bf16.astype(jnp.float32) - ref))))

    print("KERNEL_OK")
</pallas_src>

<mosaic_0001>
module attributes {stable_mosaic.version = 11 : i64} {
  func.func @smlp_kernel(%arg0: i32, %arg1: i32, %arg2: memref<1x16x128xf32, #tpu.memory_space<vmem>>, %arg3: memref<128x256xf32, #tpu.memory_space<vmem>>, %arg4: memref<1x256xf32, #tpu.memory_space<vmem>>, %arg5: memref<1x16x256xf32, #tpu.memory_space<vmem>>) attributes {dimension_semantics = [#tpu.dimension_semantics<parallel>, #tpu.dimension_semantics<parallel>], iteration_bounds = array<i64: 2, 1>, scalar_prefetch = 0 : i64, scratch_operands = 0 : i64, tpu.core_type = #tpu.core_type<tc>, window_params = [{transform_indices = @transform_0, window_bounds = array<i64: 1, 16, 128>}, {pipeline_mode = #tpu.pipeline_mode<synchronous>, transform_indices = @transform_1, window_bounds = array<i64: 128, 256>}, {pipeline_mode = #tpu.pipeline_mode<synchronous>, transform_indices = @transform_2, window_bounds = array<i64: 1, 256>}, {transform_indices = @transform_3, window_bounds = array<i64: 1, 16, 256>}]} {
    %c0 = arith.constant 0 : index
    %c0_0 = arith.constant 0 : index
    %c0_1 = arith.constant 0 : index
    %0 = vector.load %arg2[%c0, %c0_0, %c0_1] : memref<1x16x128xf32, #tpu.memory_space<vmem>>, vector<1x16x128xf32>
    %1 = vector.shape_cast %0 : vector<1x16x128xf32> to vector<16x128xf32>
    %c0_2 = arith.constant 0 : index
    %c0_3 = arith.constant 0 : index
    %2 = vector.load %arg3[%c0_2, %c0_3] : memref<128x256xf32, #tpu.memory_space<vmem>>, vector<128x256xf32>
    %cst = arith.constant dense<0.000000e+00> : vector<16x256xf32>
    %3 = tpu.matmul %1, %2, %cst {dimension_numbers = #tpu.dot_dimension_numbers<[1], [0], [0], [1], [0, 0, 1, 1], [], []>} : vector<16x128xf32>, vector<128x256xf32>, vector<16x256xf32> -> vector<16x256xf32>
    %c0_4 = arith.constant 0 : index
    %c0_5 = arith.constant 0 : index
    %4 = vector.load %arg4[%c0_4, %c0_5] : memref<1x256xf32, #tpu.memory_space<vmem>>, vector<1x256xf32>
    %5 = vector.broadcast %4 : vector<1x256xf32> to vector<16x256xf32>
    %6 = arith.addf %3, %5 : vector<16x256xf32>
    %cst_6 = arith.constant 0.000000e+00 : f32
    %7 = vector.broadcast %cst_6 : f32 to vector<16x256xf32>
    %8 = arith.cmpf ogt, %6, %7 : vector<16x256xf32>
    %cst_7 = arith.constant 2.000000e-01 : f32
    %9 = vector.broadcast %cst_7 : f32 to vector<16x256xf32>
    %10 = arith.mulf %9, %6 : vector<16x256xf32>
    %11 = arith.select %8, %6, %10 : vector<16x256xi1>, vector<16x256xf32>
    %c0_8 = arith.constant 0 : index
    %c0_9 = arith.constant 0 : index
    %c0_10 = arith.constant 0 : index
    %12 = vector.load %arg5[%c0_8, %c0_9, %c0_10] : memref<1x16x256xf32, #tpu.memory_space<vmem>>, vector<1x16x256xf32>
    %13 = vector.shape_cast %12 : vector<1x16x256xf32> to vector<16x256xf32>
    %14 = vector.shape_cast %11 : vector<16x256xf32> to vector<1x16x256xf32>
    tpu.vector_store %arg5[%c0_8, %c0_9, %c0_10], %14 {strides = array<i32>} : memref<1x16x256xf32, #tpu.memory_space<vmem>>, vector<1x16x256xf32>,
    return
  }
  func.func @transform_0(%arg0: i32, %arg1: i32) -> (i32, i32, i32) {
    %c0_i32 = arith.constant 0 : i32
    %c0_i32_0 = arith.constant 0 : i32
    return %arg0, %arg1, %c0_i32 : i32, i32, i32
  }
  func.func @transform_1(%arg0: i32, %arg1: i32) -> (i32, i32) {
    %c0_i32 = arith.constant 0 : i32
    %c0_i32_0 = arith.constant 0 : i32
    %c0_i32_1 = arith.constant 0 : i32
    return %c0_i32, %c0_i32_0 : i32, i32
  }
  func.func @transform_2(%arg0: i32, %arg1: i32) -> (i32, i32) {
    %c0_i32 = arith.constant 0 : i32
    %c0_i32_0 = arith.constant 0 : i32
    %c0_i32_1 = arith.constant 0 : i32
    return %c0_i32, %c0_i32_0 : i32, i32
  }
  func.func @transform_3(%arg0: i32, %arg1: i32) -> (i32, i32, i32) {
    %c0_i32 = arith.constant 0 : i32
    %c0_i32_0 = arith.constant 0 : i32
    return %arg0, %arg1, %c0_i32 : i32, i32, i32
  }
}

</mosaic_0001>

<bundles_post_ra>
// kernel: tpu_custom_call.1
= control target key start
LH: loop header
LB: loop body
LE: loop exit
PB: predicated region body
PF: predicated region fallthrough
CT: control target
= control target key end

     0   :  { %8 = vsyncpa [#allocation3], 0  ;;  %s1027_s0 = inlined_call_operand.hbm [shape: f32[2,16,128], index: 0, kind: input, shape index: {}]   ;;  %s1028_s1 = inlined_call_operand.hbm [shape: f32[128,256], index: 1, kind: input, shape index: {}]   ;;  %s1029_s2 = inlined_call_operand.vmem [shape: f32[1,256], index: 2, kind: input, shape index: {}]   ;;  %s1030_s3 = inlined_call_operand.hbm [shape: f32[2,16,256], index: 3, kind: output, shape index: {}]  }
   0x1   :  { %10 = vsyncpa [#allocation3 + $0x1], 0 }
   0x2   :  { %11 = vsyncpa [#allocation6], 0 }
   0x3   :  { %12 = vsyncpa [#allocation4], 0 }
   0x4   :  { %14 = vsyncpa [#allocation4 + $0x1], 0  ;;  %s800_s12 = smov 0   ;;  %s802_s13 = smov 0  }
   0x5   :  { %s804_s14 = smov 0   ;;  %s806_s15 = smov 0  }
   0x6   :  { %s808_s16 = smov 0   ;;  %s810_s17 = smov 0  }
   0x7 LB: > { %s477_s18 = sadd.s32 4294967295, %s768_s17   ;;  %s478_s19 = sadd.s32 4294967294, %s768_s17   ;;  %s768_s17 = sphi %s810_s17, %s20_s17   ;;  %s764_s16 = sphi %s808_s16, %s1054_s16   ;;  %s760_s15 = sphi %s806_s15, %s1053_s15   ;;  %s756_s14 = sphi %s804_s14, %s1052_s14   ;;  %s752_s13 = sphi %s802_s13, %s1051_s13   ;;  %s748_s12 = sphi %s800_s12, %s1050_s12  }
   0x8   : > { %p54_p0 = scmp.ne.s32.totalorder %s752_s13, %s748_s12  ;;  %p834_p1 = scmp.eq.s32.totalorder %s477_s18, 0 }
   0x9   : > { %p838_p2 = scmp.eq.s32.totalorder %s477_s18, 1  ;;  %p128_p3 = scmp.eq.s32.totalorder %s478_s19, 1 }
   0xa   : > { %s1035_s20 = scalar_select %p834_p1, 1, 0 }
   0xb   : > { %s1036_s21 = scalar_select %p838_p2, 1, 0 }
   0xc   : > { %p844_p4 = por %p834_p1, %p54_p0  ;;  %p479_p5 = scmp.ge.s32.totalorder %s768_s17, 1 }
   0xd   : > { %p849_p6 = por %p128_p3, %p54_p0  ;;  %p135_p7 = scmp.lt.s32.totalorder %s768_s17, 3 }
   0xe   : > { %s1037_s22 = scalar_select %p844_p4, 1, 0 }
   0xf   : > { %s1038_s23 = scalar_select %p849_p6, 1, 0 }
  0x10   : > { %p854_p8 = pnand %p479_p5, %p135_p7  ;;  %s770_s25 = smov [#allocation5]  }
  0x11   : > { %s147_s26 = sshll.u32 %s770_s25, 4  ;;  %s32_s28 = sadd.s32 1, %s764_s16  ;;  %s148_s26 = int_to_ptr.vmem [resolvable:$true] %s147_s26 }
  0x12   : > { %s1039_s24 = scalar_select %p854_p8, 1, 0 }
  0x13   : > { %p552_p9 = pneg %p854_p8  ;;  %s624_s4 = scalar_lea.hbm %s1028_s1, 4096 }
  0x14   : > { %p625_p12 = scmp.ne.s32.totalorder %s1028_s1, %s624_s4  ;;  %p631_p5 = scmp.lt.u32.totalorder %s624_s4, %s1028_s1 }
  0x15   : > { %p863_p11 = pnand %p552_p9, %p834_p1 }
  0x17   : > { %p626_p13 = pneg %p863_p11 }
  0x19   : > { %p627_p0 = pnand %p626_p13, %p625_p12 }
  0x1b   : > { %p628_p3 = pneg %p627_p0 }
  0x1d   : > { %p633_p7 = pnand %p631_p5, %p628_p3 }
  0x1f   : > { %636 = shalt.err (!%p633_p7)
}
  0x20   : > { %s637_s9 = scalar_lea.vmem %s148_s26, 4096  ;;  %p645_p1 = scmp.lt.s32.totalorder %s148_s26, %s148_s26 }
  0x21   : > { %p638_p9 = scmp.ne.s32.totalorder %s148_s26, %s637_s9  ;;  %p646_p4 = scmp.lt.s32.totalorder %s637_s9, %s637_s9 }
  0x23   : > { %p640_p10 = pnand %p638_p9, %p626_p13  ;;  %p647_p8 = por %p646_p4, %p645_p1 }
  0x25   : > { %p641_p6 = pneg %p640_p10 }
  0x27   : > { %p648_p2 = pnand %p647_p8, %p641_p6 }
  0x29   : > { %651 = shalt.err (!%p648_p2)
}
  0x2a   : > { %s771_s10 = smov 256   ;;  %s772_s11 = smov 16  }
  0x2b   : > { %555 = dma.hbm_to_vmem [thread:$0]  (!%p863_p11), %s1028_s1, 4096, %s148_s26, [#allocation6], %s771_s10, %s771_s10, %s772_s11  }
  0x2c   : > { %p34_p1 = scmp.ge.s32.totalorder %s32_s28, 2  ;;  %s41_s25 = sadd.s32 1, %s756_s14 }
  0x2d   : > { %p48_p2 = scmp.ne.s32.totalorder %s756_s14, %s752_s13  ;;  %p49_p4 = scmp.eq.s32.totalorder %s768_s17, 0 }
  0x2e   : > { %s1056_s28 = smov (%p34_p1, %s32_s28), 0  ;;  %p1042_p8 = scmp.ne.s32.totalorder %s1036_s21, 0 }
  0x2f   : > { %p890_p6 = por %p49_p4, %p48_p2  ;;  %s36_s27 = ssub.s32 %s764_s16, %s1056_s28 }
  0x30   : > { %p896_p10 = por %p1042_p8, %p48_p2  ;;  %p565_p12 = scmp.lt.s32.totalorder %s768_s17, 2 }
  0x31   : > { %p39_p11 = scmp.eq.s32.totalorder %s36_s27, 0  ;;  %s164_s26 = sand.u32 1, %s756_s14  }
  0x32   : > { %s482_s4 = sshll.u32 %s164_s26, 4  ;;  %s494_s6 = sshll.u32 %s764_s16, 8 }
  0x33   : > { %s905_s5 = scalar_select %p39_p11, %s756_s14, %s41_s25  }
  0x34   : > { %s911_s9 = scalar_lea.hbm %s1027_s0, %s494_s6  ;;  %s168_s21 = scalar_lea.vmem [#allocation2], %s482_s4 }
  0x35   : > { %s177_s10 = sshll.u32 %s168_s21, 4  ;;  %p917_p13 = pnand %p565_p12, %p890_p6  ;;  %s913_s10 = int_to_ptr.vmem [resolvable:$true] %s177_s10 }
  0x36   : > { %s921_s18 = scalar_lea.sflag [#allocation3], %s164_s26  ;;  %s652_s19 = scalar_lea.hbm %s911_s9, 256 }
  0x37   : > { %p653_p0 = scmp.ne.s32.totalorder %s911_s9, %s652_s19  ;;  %p654_p3 = pneg %p917_p13 }
  0x38   : > { %s657_s29 = scalar_lea.hbm %s1027_s0, 512  ;;  %p658_p9 = scmp.lt.u32.totalorder %s911_s9, %s1027_s0 }
  0x39   : > { %p655_p5 = pnand %p654_p3, %p653_p0  ;;  %p659_p1 = scmp.lt.u32.totalorder %s657_s29, %s652_s19 }
  0x3a   : > { %p661_p4 = scmp.lt.u32.totalorder %s652_s19, %s911_s9 }
  0x3b   : > { %p656_p7 = pneg %p655_p5  ;;  %p660_p2 = por %p659_p1, %p658_p9 }
  0x3d   : > { %p662_p6 = por %p661_p4, %p660_p2 }
  0x3f   : > { %p663_p8 = pnand %p662_p6, %p656_p7 }
  0x41   : > { %666 = shalt.err (!%p663_p8)
}
  0x42   : > { %s667_s26 = scalar_lea.vmem %s913_s10, 256  ;;  %s773_s7 = smov [#allocation2]  }
  0x43   : > { %p668_p12 = scmp.ne.s32.totalorder %s913_s10, %s667_s26  ;;  %s672_s8 = sshll.u32 %s773_s7, 4  ;;  %s673_s8 = int_to_ptr.vmem [resolvable:$false] %s672_s8 }
  0x44   : > { %s674_s21 = scalar_lea.vmem %s673_s8, 512  ;;  %p675_p5 = scmp.lt.s32.totalorder %s913_s10, %s673_s8 }
  0x45   : > { %p670_p11 = pnand %p668_p12, %p654_p3  ;;  %p676_p9 = scmp.lt.s32.totalorder %s674_s21, %s667_s26 }
  0x47   : > { %p671_p0 = pneg %p670_p11  ;;  %p677_p1 = por %p676_p9, %p675_p5 }
  0x49   : > { %p678_p2 = pnand %p677_p1, %p671_p0 }
  0x4b   : > { %681 = shalt.err (!%p678_p2)
}
  0x4c   : > { %s774_s19 = smov 128   ;;  %s775_s25 = smov 8  }
  0x4d   : > { %559 = dma.hbm_to_vmem [thread:$0]  (!%p917_p13), %s911_s9, 256, %s913_s10, %s921_s18, %s774_s19, %s774_s19, %s775_s25  }
  0x4e   : > { %p1045_p3 = scmp.ne.s32.totalorder %s1039_s24, 0 }
  0x4f   : > { %s952_s27 = sand.u32 (!%p1045_p3), 1, %s752_s13   ;;  %p1046_p7 = scmp.ne.s32.totalorder (!%p1045_p3), %s1037_s22, 0 }
  0x50   : > { %189 = sbr.rel (%p1045_p3) target bundleno = 359 (0x167), region = 32  ;;  %s486_s29 = sshll.u32 (!%p1045_p3), %s952_s27, 4 }
  0x51   : > { %s192_s4 = scalar_lea.sflag (!%p1045_p3), [#allocation3], %s952_s27  ;;  %s956_s6 = scalar_lea.vmem (!%p1045_p3), [#allocation2], %s486_s29 }
  0x57   : > { %735 = dma.done.wait (%p1046_p7), %s192_s4, 256  }
  0x58   : > { %737 = vsyncadd (%p1046_p7), %s192_s4, 4294967040  ;;  %p1047_p13 = scmp.ne.s32.totalorder %s1035_s20, 0 }
  0x5a   : > { %739 = dma.done.wait (%p1047_p13), [#allocation6], 4096  }
  0x5b   : > { %741 = vsyncadd (%p1047_p13), [#allocation6], 4294963200  ;;  %v776_v0 = vmov 0.0   ;;  %v227_v1 = vld [vmem:[#allocation5 + $0x8] sm:$0xff]  ;;  %v229_v2 = vld [vmem:[#allocation5 + $0x18] sm:$0xff]  ;;  %v260_v51 = vlaneseq  ;;  %s488_s24 = sshll.u32 %s952_s27, 5 }
  0x5c   : > { %334 = vmatprep.mubr.f32.mxu0 %v776_v0  ;;  %340 = vmatprep.mubr.f32.mxu1 %v776_v0  ;;  %v226_v3 = vld [vmem:[#allocation5] sm:$0xff]  ;;  %v496_v4 = vpack.c.bf16 %v229_v2, %v227_v1  ;;  %v228_v5 = vld [vmem:[#allocation5 + $0x10] sm:$0xff]  ;;  %v231_v6 = vld [vmem:[#allocation5 + $0x28] sm:$0xff]  ;;  %s221_s9 = scalar_lea.vmem [#allocation7], %s488_s24  ;;  %s495_s11 = sshll.u32 %s760_s15, 9 }
  0x5d   : > { %v233_v7 = vld [vmem:[#allocation5 + $0x38] sm:$0xff]  ;;  %v498_v8 = vpack.c.bf16 %v228_v5, %v226_v3  ;;  %v230_v10 = vld [vmem:[#allocation5 + $0x20] sm:$0xff]  ;;  %v232_v11 = vld [vmem:[#allocation5 + $0x30] sm:$0xff]  ;;  %v261_v52 = vshrl.u32 %v260_v51, 7  ;;  %s380_s10 = sshll.u32 %s221_s9, 4  ;;  %s978_s15 = scalar_lea.hbm %s1030_s3, %s495_s11  ;;  %s973_s10 = int_to_ptr.vmem [resolvable:$true] %s380_s10 }
  0x5e   : > { %v500_v9 = vpack.c.bf16 %v233_v7, %v231_v6  ;;  %v235_v12 = vld [vmem:[#allocation5 + $0x48] sm:$0xff]  ;;  %497 = vmatprep.subr.bf16.mxu0 %v496_v4  ;;  %528 = vmatprep.subr.bf16.mxu1 %v496_v4  ;;  %v237_v13 = vld [vmem:[#allocation5 + $0x58] sm:$0xff]  ;;  %v502_v14 = vpack.c.bf16 %v232_v11, %v230_v10  ;;  %v234_v16 = vld [vmem:[#allocation5 + $0x40] sm:$0xff]  ;;  %s364_s7 = scalar_lea.sflag [#allocation4], %s952_s27  ;;  %s682_s8 = scalar_lea.vmem %s973_s10, 512 }
  0x5f   : > { %499 = vmatpush1.bf16.msra.mxu0 %v498_v8  ;;  %536 = vmatpush1.bf16.msra.mxu1 %v498_v8  ;;  %v504_v15 = vpack.c.bf16 %v237_v13, %v235_v12  ;;  %v236_v17 = vld [vmem:[#allocation5 + $0x50] sm:$0xff]  ;;  %v239_v18 = vld [vmem:[#allocation5 + $0x68] sm:$0xff]  ;;  %v241_v19 = vld [vmem:[#allocation5 + $0x78] sm:$0xff]  ;;  %v262_v53 = vsub.s32 0, %v261_v52  ;;  %v266_v55 = vsub.s32 1, %v261_v52  ;;  %p683_p4 = scmp.ne.s32.totalorder %s973_s10, %s682_s8  ;;  %s777_s21 = smov [#allocation7]  }
  0x60   : > { %501 = vmatprep.subr.bf16.mxu0 %v500_v9  ;;  %529 = vmatprep.subr.bf16.mxu1 %v500_v9  ;;  %v506_v20 = vpack.c.bf16 %v236_v17, %v234_v16  ;;  %v508_v21 = vpack.c.bf16 %v241_v19, %v239_v18  ;;  %v238_v22 = vld [vmem:[#allocation5 + $0x60] sm:$0xff]  ;;  %v240_v23 = vld [vmem:[#allocation5 + $0x70] sm:$0xff]  ;;  %v243_v24 = vld [vmem:[#allocation5 + $0x88] sm:$0xff]  ;;  %s686_s19 = sshll.u32 %s777_s21, 4  ;;  %s687_s19 = int_to_ptr.vmem [resolvable:$false] %s686_s19 }
  0x61   : > { %v245_v25 = vld [vmem:[#allocation5 + $0x98] sm:$0xff]  ;;  %v510_v26 = vpack.c.bf16 %v240_v23, %v238_v22  ;;  %v242_v28 = vld [vmem:[#allocation5 + $0x80] sm:$0xff]  ;;  %v244_v29 = vld [vmem:[#allocation5 + $0x90] sm:$0xff]  ;;  %p684_p6 = pnand %p683_p4, %p896_p10  ;;  %s688_s25 = scalar_lea.vmem %s687_s19, 1024 }
  0x62   : > { %v512_v27 = vpack.c.bf16 %v245_v25, %v243_v24  ;;  %v247_v30 = vld [vmem:[#allocation5 + $0xa8] sm:$0xff]  ;;  %v249_v31 = vld [vmem:[#allocation5 + $0xb8] sm:$0xff]  ;;  %v514_v32 = vpack.c.bf16 %v244_v29, %v242_v28  ;;  %v246_v34 = vld [vmem:[#allocation5 + $0xa0] sm:$0xff]  ;;  %p689_p12 = scmp.lt.s32.totalorder %s973_s10, %s687_s19  ;;  %p690_p11 = scmp.lt.s32.totalorder %s688_s25, %s682_s8 }
  0x63   : > { %503 = vmatpush1.bf16.msra.mxu0 %v502_v14  ;;  %537 = vmatpush1.bf16.msra.mxu1 %v502_v14  ;;  %v516_v33 = vpack.c.bf16 %v249_v31, %v247_v30  ;;  %v248_v35 = vld [vmem:[#allocation5 + $0xb0] sm:$0xff]  ;;  %v251_v36 = vld [vmem:[#allocation5 + $0xc8] sm:$0xff]  ;;  %v253_v37 = vld [vmem:[#allocation5 + $0xd8] sm:$0xff]  ;;  %p685_p8 = pneg %p684_p6 }
  0x64   : > { %505 = vmatprep.subr.bf16.mxu0 %v504_v15  ;;  %530 = vmatprep.subr.bf16.mxu1 %v504_v15  ;;  %v518_v38 = vpack.c.bf16 %v248_v35, %v246_v34  ;;  %v520_v39 = vpack.c.bf16 %v253_v37, %v251_v36  ;;  %v250_v40 = vld [vmem:[#allocation5 + $0xc0] sm:$0xff]  ;;  %v252_v41 = vld [vmem:[#allocation5 + $0xd0] sm:$0xff]  ;;  %v255_v42 = vld [vmem:[#allocation5 + $0xe8] sm:$0xff]  ;;  %p691_p0 = por %p690_p11, %p689_p12 }
  0x65   : > { %v257_v43 = vld [vmem:[#allocation5 + $0xf8] sm:$0xff]  ;;  %v522_v44 = vpack.c.bf16 %v252_v41, %v250_v40  ;;  %v254_v46 = vld [vmem:[#allocation5 + $0xe0] sm:$0xff]  ;;  %v256_v47 = vld [vmem:[#allocation5 + $0xf0] sm:$0xff] }
  0x66   : > { %v524_v45 = vpack.c.bf16 %v257_v43, %v255_v42  ;;  %v526_v48 = vpack.c.bf16 %v256_v47, %v254_v46  ;;  %v224_v49 = vld [vmem:[%s956_s6] sm:$0xff]  ;;  %v225_v50 = vld [vmem:[%s956_s6 + $0x8] sm:$0xff]  ;;  %p692_p5 = pnand %p691_p0, %p685_p8 }
  0x67   : > { %507 = vmatpush1.bf16.msra.mxu0 %v506_v20  ;;  %538 = vmatpush1.bf16.msra.mxu1 %v506_v20  ;;  %v258_v54 = vld [vmem:[%s1029_s2] sm:$0x3] }
  0x68   : > { %509 = vmatprep.subr.bf16.mxu0 %v508_v21  ;;  %531 = vmatprep.subr.bf16.mxu1 %v508_v21  ;;  %v263_v56 = vrot.slane %v258_v54, %v262_v53  ;;  %v267_v57 = vrot.slane %v258_v54, %v266_v55 }
  0x6b   : > { %511 = vmatpush1.bf16.msra.mxu0 %v510_v26  ;;  %539 = vmatpush1.bf16.msra.mxu1 %v510_v26 }
  0x6c   : > { %513 = vmatprep.subr.bf16.mxu0 %v512_v27  ;;  %532 = vmatprep.subr.bf16.mxu1 %v512_v27 }
  0x6f   : > { %515 = vmatpush1.bf16.msra.mxu0 %v514_v32  ;;  %540 = vmatpush1.bf16.msra.mxu1 %v514_v32 }
  0x70   : > { %517 = vmatprep.subr.bf16.mxu0 %v516_v33  ;;  %533 = vmatprep.subr.bf16.mxu1 %v516_v33 }
  0x73   : > { %519 = vmatpush1.bf16.msra.mxu0 %v518_v38  ;;  %541 = vmatpush1.bf16.msra.mxu1 %v518_v38 }
  0x74   : > { %521 = vmatprep.subr.bf16.mxu0 %v520_v39  ;;  %534 = vmatprep.subr.bf16.mxu1 %v520_v39 }
  0x77   : > { %523 = vmatpush1.bf16.msra.mxu0 %v522_v44  ;;  %542 = vmatpush1.bf16.msra.mxu1 %v522_v44 }
  0x78   : > { %525 = vmatprep.subr.bf16.mxu0 %v524_v45  ;;  %535 = vmatprep.subr.bf16.mxu1 %v524_v45 }
  0x7b   : > { %527 = vmatpush1.bf16.msra.mxu0 %v526_v48  ;;  %543 = vmatpush1.bf16.msra.mxu1 %v526_v48 }
  0x7e   : > { %335 = vmatmul.mubr.f32.vlgmr.msra.gmra.mrb[0].mxu0 %v224_v49  ;;  %341 = vmatmul.mubr.f32.vlgmr.msra.gmra.mrb[0].mxu1 %v225_v50 }
 0x151   : > { %v336_v58 = vpop.f32.mrb[0].mxu0  ;;  %v342_v59 = vpop.f32.mrb[0].mxu1 }
 0x152   : > { %v337_v60 = vadd.f32 %v336_v58, %v263_v56  ;;  %v343_v61 = vadd.f32 %v342_v59, %v263_v56  ;;  %v338_v62 = vpop.f32.mrb[1].mxu0  ;;  %v344_v63 = vpop.f32.mrb[1].mxu1 }
 0x153   : > { %v339_v0 = vadd.f32 %v338_v62, %v267_v57  ;;  %v345_v1 = vadd.f32 %v344_v63, %v267_v57 }
 0x154   : > { %vm347_vm0 = vcmp.gt.f32.partialorder %v337_v60, 0.0  ;;  %v351_v2 = vmul.f32 0.2, %v337_v60  ;;  %vm349_vm1 = vcmp.gt.f32.partialorder %v343_v61, 0.0  ;;  %v353_v3 = vmul.f32 0.2, %v343_v61 }
 0x155   : > { %vm348_vm2 = vcmp.gt.f32.partialorder %v339_v0, 0.0  ;;  %v352_v4 = vmul.f32 0.2, %v339_v0  ;;  %vm350_vm3 = vcmp.gt.f32.partialorder %v345_v1, 0.0  ;;  %v354_v5 = vmul.f32 0.2, %v345_v1 }
 0x156   : > { %v355_v6 = vsel %vm347_vm0, %v337_v60, %v351_v2  ;;  %v357_v7 = vsel %vm349_vm1, %v343_v61, %v353_v3 }
 0x157   : > { %359 = vst [vmem:[%s221_s9] sm:$0xff] %v355_v6  ;;  %361 = vst [vmem:[%s221_s9 + $0x10] sm:$0xff] %v357_v7  ;;  %v356_v8 = vsel %vm348_vm2, %v339_v0, %v352_v4  ;;  %v358_v9 = vsel %vm350_vm3, %v345_v1, %v354_v5 }
 0x158   : > { %360 = vst [vmem:[%s221_s9 + $0x8] sm:$0xff] %v356_v8  ;;  %362 = vst [vmem:[%s221_s9 + $0x18] sm:$0xff] %v358_v9 }
 0x159   : > { %695 = shalt.err (!%p692_p5)
}
 0x15a   : > { %s696_s29 = scalar_lea.hbm %s978_s15, 512  ;;  %s700_s20 = scalar_lea.hbm %s1030_s3, 1024 }
 0x15b   : > { %p697_p9 = scmp.ne.s32.totalorder %s978_s15, %s696_s29  ;;  %p701_p3 = scmp.lt.u32.totalorder %s978_s15, %s1030_s3 }
 0x15c   : > { %p702_p7 = scmp.lt.u32.totalorder %s700_s20, %s696_s29  ;;  %p704_p4 = scmp.lt.u32.totalorder %s696_s29, %s978_s15 }
 0x15d   : > { %p698_p1 = pnand %p697_p9, %p896_p10 }
 0x15e   : > { %p703_p13 = por %p702_p7, %p701_p3 }
 0x15f   : > { %p699_p2 = pneg %p698_p1 }
 0x160   : > { %p705_p6 = por %p704_p4, %p703_p13 }
 0x162   : > { %p706_p8 = pnand %p705_p6, %p699_p2 }
 0x164   : > { %709 = shalt.err (!%p706_p8)
}
 0x165   : > { %s778_s9 = smov 256   ;;  %s779_s11 = smov 16  }
 0x166   : > { %550 = dma.vmem_to_hbm [thread:$0]  (%p896_p10), %s973_s10, 512, %s978_s15, %s364_s7, %s778_s9, %s778_s9, %s779_s11  }
 0x167 PF: > { %s395_s18 = sand.u32 1, %s748_s12   ;;  %p1048_p12 = scmp.ne.s32.totalorder %s1038_s23, 0 }
 0x168   : > { %p1049_p11 = scmp.ge.s32.totalorder %s768_s17, 2  ;;  %s396_s26 = scalar_lea.sflag [#allocation4], %s395_s18 }
 0x16a   : > { %p561_p0 = pnand %p1049_p11, %p1048_p12 }
 0x16c   : > { %743 = dma.done.wait (!%p561_p0), %s396_s26, 512  }
 0x16d   : > { %745 = vsyncadd (!%p561_p0), %s396_s26, 4294966784  ;;  %s20_s17 = sadd.s32 1, %s768_s17   ;;  %s1050_s12 = smov %s752_s13 }
 0x16e   : > { %p17_p5 = scmp.ge.s32.totalorder %s20_s17, 4   ;;  %s1051_s13 = smov %s756_s14 }
 0x16f   : > { %s1052_s14 = smov %s905_s5  ;;  %s1053_s15 = smov %s764_s16 }
 0x170   : > { %s1054_s16 = smov %s1056_s28  ;;  %19 = sbr.rel (!%p17_p5) target bundleno = 7 (0x7), region = 81 }
 0x177   :  { %401 = vsyncpa [#allocation3], 1 }
 0x178   :  { %403 = vsyncpa [#allocation3 + $0x1], 1 }
 0x179   :  { %404 = vsyncpa [#allocation6], 1 }
 0x17a   :  { %405 = vsyncpa [#allocation4], 1 }
 0x17b   :  { %407 = vsyncpa [#allocation4 + $0x1], 1 }

</bundles_post_ra>
